<compile_context>
chip_gen: v5e
topology: v5e:2x2
jax: 0.10.0
libtpu: 0.0.40
codegen_flags: <defaults>
</compile_context>

<pallas_src>
import math

import jax
import jax.numpy as jnp
from jax.experimental import pallas as pl
from jax.experimental.pallas import tpu as pltpu


def _cdiv(a, b):
    return -(-a // b)


def _round_up(a, b):
    return _cdiv(a, b) * b


# ------------------------------ Pallas kernel ------------------------------ #
def _upsample_matmul_kernel(x_ref, w_ref, b_ref, o_ref):
    # x_ref: (1, Ck, tile_flat)   tap-folded input columns (flat spatial = lanes)
    # w_ref: (co_big, Ck)         phase-major, tap-folded weight
    # b_ref: (co_big, 1)          phase-replicated bias (f32)
    # o_ref: (1, co_big, tile_flat)
    y = jnp.dot(w_ref[...], x_ref[0], preferred_element_type=jnp.float32)
    o_ref[0] = (y + b_ref[...]).astype(o_ref.dtype)


# --------------------------------- wrapper --------------------------------- #
def conv_transpose2d_pallas(x, weight, bias, stride, *,
                            block_budget_bytes=24 * 1024 * 1024):
    """PyTorch-equivalent ConvTranspose2d forward.

    x:      (N, C_in, H, W)
    weight: (C_in, C_out, K, K)   (PyTorch ConvTranspose2d layout)
    bias:   (C_out,)
    returns (N, C_out, (H-1)*stride + K, (W-1)*stride + K)
    """
    N, C_in, H, W = x.shape
    w_cin, C_out, K, K2 = weight.shape
    assert w_cin == C_in and K == K2, "weight must have shape (C_in, C_out, K, K)"
    S = int(stride)

    T = _cdiv(K, S)                     # taps per axis on the undilated input
    H_out = (H - 1) * S + K
    W_out = (W - 1) * S + K
    Q_h = H + T - 1                     # per-phase output rows
    Q_w = W + T - 1                     # per-phase output cols (= flat row stride)
    co_big = S * S * C_out              # phases folded into output channels
    Ck = T * T * C_in                   # taps folded into the contraction
    L_needed = Q_h * Q_w
    itemsize = jnp.dtype(x.dtype).itemsize

    # Spatial tile (lanes) from a VMEM budget; multiples of 1024 keep every
    # load/store unmasked.  Channel dims are sublane-padded so the estimate
    # matches what Mosaic actually allocates.
    ck_pad = _round_up(Ck, 8)
    co_pad = _round_up(co_big, 8)
    per_elem = itemsize * 2 * (ck_pad + co_pad)        # double-buffered in + out
    budget_tile = max(1024, (block_budget_bytes // per_elem) // 1024 * 1024)
    n_tiles = _cdiv(L_needed, budget_tile)
    tile_flat = _round_up(_cdiv(L_needed, n_tiles), 1024)
    L_pad = n_tiles * tile_flat

    # ---- wrapper-side layout plumbing (no arithmetic) ----
    # X2[(m_h, m_w, ci), q*Q_w + w] = x[ci, q - m_h, w - m_w]  (0 outside).
    # For K == S (T == 1) this is just x in NCHW with a zero tail.
    R_pad = _cdiv(L_pad, Q_w)
    x2 = jnp.zeros((N, T, T, C_in, R_pad, Q_w), x.dtype)
    for m_h in range(T):
        for m_w in range(T):
            x2 = x2.at[:, m_h, m_w, :, m_h:m_h + H, m_w:m_w + W].set(x)
    x2 = x2.reshape(N, Ck, R_pad * Q_w)[:, :, :L_pad]

    # W2[(r_h, r_w, co), (m_h, m_w, ci)] = weight[ci, co, r_h + S*m_h, r_w + S*m_w]
    # with zeros where the kernel index exceeds K-1.
    Kp = S * T
    w_pad = jnp.zeros((C_in, C_out, Kp, Kp), weight.dtype)
    w_pad = w_pad.at[:, :, :K, :K].set(weight)
    w6 = w_pad.reshape(C_in, C_out, T, S, T, S)        # (ci, co, m_h, r_h, m_w, r_w)
    w2 = jnp.transpose(w6, (3, 5, 1, 2, 4, 0)).reshape(co_big, Ck).astype(x.dtype)

    b2 = jnp.tile(bias.astype(jnp.float32), S * S).reshape(co_big, 1)

    # VMEM / cost accounting (actual padded block sizes, undilated input).
    x_blk_bytes = ck_pad * tile_flat * itemsize
    o_blk_bytes = co_pad * tile_flat * itemsize
    w_bytes = co_pad * _round_up(Ck, 128) * itemsize
    vmem_need = 2 * (x_blk_bytes + o_blk_bytes) + w_bytes + (2 << 20)
    vmem_limit = int(min(max(vmem_need, 32 * 1024 * 1024), 64 * 1024 * 1024))

    flops = 2 * N * L_pad * co_big * Ck
    bytes_accessed = ((x2.size + w2.size) * itemsize + b2.size * 4
                      + N * co_big * L_pad * itemsize)

    out_flat = pl.pallas_call(
        _upsample_matmul_kernel,
        out_shape=jax.ShapeDtypeStruct((N, co_big, L_pad), x.dtype),
        grid_spec=pltpu.PrefetchScalarGridSpec(
            num_scalar_prefetch=0,
            grid=(N, n_tiles),
            in_specs=[
                pl.BlockSpec((1, Ck, tile_flat), lambda n, t: (n, 0, t)),
                pl.BlockSpec((co_big, Ck), lambda n, t: (0, 0)),
                pl.BlockSpec((co_big, 1), lambda n, t: (0, 0)),
            ],
            out_specs=pl.BlockSpec((1, co_big, tile_flat),
                                   lambda n, t: (n, 0, t)),
        ),
        compiler_params=pltpu.CompilerParams(
            dimension_semantics=("parallel", "parallel"),
            vmem_limit_bytes=vmem_limit,
        ),
        cost_estimate=pl.CostEstimate(
            flops=flops, transcendentals=0, bytes_accessed=bytes_accessed),
    )(x2, w2, b2)

    # ---- inverse pixel-shuffle: interleave the S*S phases back to NCHW ----
    y = out_flat[:, :, :L_needed].reshape(N, S, S, C_out, Q_h, Q_w)
    y = jnp.transpose(y, (0, 3, 4, 1, 5, 2))            # (N, C_out, Q_h, S, Q_w, S)
    y = y.reshape(N, C_out, Q_h * S, Q_w * S)
    return y[:, :, :H_out, :W_out]


# ------------------------------ module wrapper ------------------------------ #
class UpsamplePallas:
    """Pallas port of Upsample(input_dim, output_dim, kernel, stride)."""

    def __init__(self, input_dim, output_dim, kernel, stride, *, key=None,
                 dtype=jnp.float32):
        self.input_dim = int(input_dim)
        self.output_dim = int(output_dim)
        self.kernel = int(kernel)
        self.stride = int(stride)
        if key is None:
            key = jax.random.PRNGKey(0)
        k_w, k_b = jax.random.split(key)
        # PyTorch default init: U(-b, b) with b = 1/sqrt(fan_in),
        # fan_in = out_channels * K * K for the (C_in, C_out, K, K) layout.
        bound = 1.0 / math.sqrt(self.output_dim * self.kernel * self.kernel)
        self.weight = jax.random.uniform(
            k_w, (self.input_dim, self.output_dim, self.kernel, self.kernel),
            dtype=dtype, minval=-bound, maxval=bound)
        self.bias = jax.random.uniform(
            k_b, (self.output_dim,), dtype=dtype, minval=-bound, maxval=bound)

    def __call__(self, x):
        return conv_transpose2d_pallas(x, self.weight, self.bias, self.stride)


# ------------------------------ reference (JAX) ----------------------------- #
def _ref_conv_transpose2d(x, weight, bias, stride):
    # Independent reference via XLA's dilated convolution.
    K = weight.shape[2]
    w = jnp.transpose(weight[:, :, ::-1, ::-1], (1, 0, 2, 3))     # (C_out, C_in, K, K)
    y = jax.lax.conv_general_dilated(
        x, w,
        window_strides=(1, 1),
        padding=[(K - 1, K - 1), (K - 1, K - 1)],
        lhs_dilation=(stride, stride),
        dimension_numbers=("NCHW", "OIHW", "NCHW"),
        precision=jax.lax.Precision.HIGHEST)
    return y + bias[None, :, None, None]


if __name__ == "__main__":
    key = jax.random.PRNGKey(0)
    kx, kp1, kp2 = jax.random.split(key, 3)

    # UNet-style upsample: batch=2, input_dim=4, output_dim=8, 16x16 spatial.
    N, C_in, H, W = 2, 4, 16, 16
    C_out = 8
    x = jax.random.normal(kx, (N, C_in, H, W), dtype=jnp.float32)

    # K == S (typical UNet upsample): single-matmul pixel-shuffle path.
    up = UpsamplePallas(C_in, C_out, 2, 2, key=kp1)
    y = jax.block_until_ready(up(x))
    assert y.shape == (N, C_out, 32, 32)
    ref = _ref_conv_transpose2d(x, up.weight, up.bias, 2)
    # Tolerance covers default (bf16-pass) MXU precision vs the f32 reference.
    assert jnp.allclose(y, ref, atol=2e-2, rtol=2e-2), float(jnp.max(jnp.abs(y - ref)))

    # K > S (overlapping taps): tap-folded contraction path.
    up2 = UpsamplePallas(C_in, C_out, 3, 2, key=kp2)
    y2 = jax.block_until_ready(up2(x))
    assert y2.shape == (N, C_out, 33, 33)
    ref2 = _ref_conv_transpose2d(x, up2.weight, up2.bias, 2)
    assert jnp.allclose(y2, ref2, atol=2e-2, rtol=2e-2), float(jnp.max(jnp.abs(y2 - ref2)))

    print("KERNEL_OK")
</pallas_src>

<mosaic_0001>
module attributes {stable_mosaic.version = 11 : i64} {
  func.func @_upsample_matmul_kernel(%arg0: i32, %arg1: i32, %arg2: memref<1x4x1024xf32, #tpu.memory_space<vmem>>, %arg3: memref<32x4xf32, #tpu.memory_space<vmem>>, %arg4: memref<32x1xf32, #tpu.memory_space<vmem>>, %arg5: memref<1x32x1024xf32, #tpu.memory_space<vmem>>) attributes {dimension_semantics = [#tpu.dimension_semantics<parallel>, #tpu.dimension_semantics<parallel>], iteration_bounds = array<i64: 2, 1>, scalar_prefetch = 0 : i64, scratch_operands = 0 : i64, tpu.core_type = #tpu.core_type<tc>, window_params = [{transform_indices = @transform_0, window_bounds = array<i64: 1, 4, 1024>}, {pipeline_mode = #tpu.pipeline_mode<synchronous>, transform_indices = @transform_1, window_bounds = array<i64: 32, 4>}, {pipeline_mode = #tpu.pipeline_mode<synchronous>, transform_indices = @transform_2, window_bounds = array<i64: 32, 1>}, {transform_indices = @transform_3, window_bounds = array<i64: 1, 32, 1024>}]} {
    %c0 = arith.constant 0 : index
    %c0_0 = arith.constant 0 : index
    %0 = vector.load %arg3[%c0, %c0_0] : memref<32x4xf32, #tpu.memory_space<vmem>>, vector<32x4xf32>
    %c0_1 = arith.constant 0 : index
    %c0_2 = arith.constant 0 : index
    %c0_3 = arith.constant 0 : index
    %1 = vector.load %arg2[%c0_1, %c0_2, %c0_3] : memref<1x4x1024xf32, #tpu.memory_space<vmem>>, vector<1x4x1024xf32>
    %2 = vector.shape_cast %1 : vector<1x4x1024xf32> to vector<4x1024xf32>
    %cst = arith.constant dense<0.000000e+00> : vector<32x1024xf32>
    %3 = tpu.matmul %0, %2, %cst {dimension_numbers = #tpu.dot_dimension_numbers<[1], [0], [0], [1], [0, 0, 1, 1], [], []>} : vector<32x4xf32>, vector<4x1024xf32>, vector<32x1024xf32> -> vector<32x1024xf32>
    %c0_4 = arith.constant 0 : index
    %c0_5 = arith.constant 0 : index
    %4 = vector.load %arg4[%c0_4, %c0_5] : memref<32x1xf32, #tpu.memory_space<vmem>>, vector<32x1xf32>
    %5 = vector.broadcast %4 : vector<32x1xf32> to vector<32x1024xf32>
    %6 = arith.addf %3, %5 : vector<32x1024xf32>
    %c0_6 = arith.constant 0 : index
    %c0_7 = arith.constant 0 : index
    %c0_8 = arith.constant 0 : index
    %7 = vector.load %arg5[%c0_6, %c0_7, %c0_8] : memref<1x32x1024xf32, #tpu.memory_space<vmem>>, vector<1x32x1024xf32>
    %8 = vector.shape_cast %7 : vector<1x32x1024xf32> to vector<32x1024xf32>
    %9 = vector.shape_cast %6 : vector<32x1024xf32> to vector<1x32x1024xf32>
    tpu.vector_store %arg5[%c0_6, %c0_7, %c0_8], %9 {strides = array<i32>} : memref<1x32x1024xf32, #tpu.memory_space<vmem>>, vector<1x32x1024xf32>,
    return
  }
  func.func @transform_0(%arg0: i32, %arg1: i32) -> (i32, i32, i32) {
    %c0_i32 = arith.constant 0 : i32
    %c0_i32_0 = arith.constant 0 : i32
    return %arg0, %c0_i32, %arg1 : i32, i32, i32
  }
  func.func @transform_1(%arg0: i32, %arg1: i32) -> (i32, i32) {
    %c0_i32 = arith.constant 0 : i32
    %c0_i32_0 = arith.constant 0 : i32
    %c0_i32_1 = arith.constant 0 : i32
    return %c0_i32, %c0_i32_0 : i32, i32
  }
  func.func @transform_2(%arg0: i32, %arg1: i32) -> (i32, i32) {
    %c0_i32 = arith.constant 0 : i32
    %c0_i32_0 = arith.constant 0 : i32
    %c0_i32_1 = arith.constant 0 : i32
    return %c0_i32, %c0_i32_0 : i32, i32
  }
  func.func @transform_3(%arg0: i32, %arg1: i32) -> (i32, i32, i32) {
    %c0_i32 = arith.constant 0 : i32
    %c0_i32_0 = arith.constant 0 : i32
    return %arg0, %c0_i32, %arg1 : i32, i32, i32
  }
}

</mosaic_0001>

<bundles_post_ra>
// kernel: tpu_custom_call.1
= control target key start
LH: loop header
LB: loop body
LE: loop exit
PB: predicated region body
PF: predicated region fallthrough
CT: control target
= control target key end

     0   :  { %8 = vsyncpa [#allocation3], 0  ;;  %s1100_s0 = inlined_call_operand.vmem [shape: f32[2,4,1024], index: 0, kind: input, shape index: {}]   ;;  %s1101_s1 = inlined_call_operand.vmem [shape: f32[32,4], index: 1, kind: input, shape index: {}]   ;;  %s1102_s2 = inlined_call_operand.vmem [shape: f32[32,1], index: 2, kind: input, shape index: {}]   ;;  %s1103_s3 = inlined_call_operand.hbm [shape: f32[2,32,1024], index: 3, kind: output, shape index: {}]  }
   0x1   :  { %10 = vsyncpa [#allocation3 + $0x1], 0  ;;  %s860_s12 = smov 0   ;;  %s862_s13 = smov 0  }
   0x2   :  { %s864_s14 = smov 0   ;;  %s866_s15 = smov 0  }
   0x3   :  { %s868_s16 = smov 0   ;;  %s870_s17 = smov 0  }
   0x4 LB: > { %s642_s18 = sadd.s32 4294967295, %s835_s17   ;;  %s643_s19 = sadd.s32 4294967294, %s835_s17   ;;  %s835_s17 = sphi %s870_s17, %s16_s17   ;;  %s831_s16 = sphi %s868_s16, %s1110_s16   ;;  %s827_s15 = sphi %s866_s15, %s1109_s15   ;;  %s823_s14 = sphi %s864_s14, %s1108_s14   ;;  %s819_s13 = sphi %s862_s13, %s1107_s13   ;;  %s815_s12 = sphi %s860_s12, %s1106_s12  }
   0x5   : > { %s28_s20 = sadd.s32 1, %s831_s16  ;;  %s107_s21 = sadd.s32 1, %s823_s14 }
   0x6   : > { %p30_p0 = scmp.ge.s32.totalorder %s28_s20, 2  ;;  %p117_p1 = scmp.ne.s32.totalorder %s823_s14, %s819_s13 }
   0x7   : > { %p118_p2 = scmp.eq.s32.totalorder %s642_s18, 1  ;;  %p123_p3 = scmp.ne.s32.totalorder %s819_s13, %s815_s12 }
   0x8   : > { %s1112_s20 = smov (%p30_p0, %s28_s20), 0  ;;  %p124_p5 = scmp.eq.s32.totalorder %s643_s19, 1 }
   0x9   : > { %p900_p4 = por %p118_p2, %p117_p1  ;;  %s102_s23 = ssub.s32 %s831_s16, %s1112_s20 }
   0xa   : > { %p646_p6 = scmp.ge.s32.totalorder %s835_s17, 1  ;;  %p105_p7 = scmp.eq.s32.totalorder %s102_s23, 0 }
   0xb   : > { %p907_p8 = por %p124_p5, %p123_p3  ;;  %p161_p9 = scmp.lt.s32.totalorder %s835_s17, 3 }
   0xc   : > { %s913_s25 = scalar_select %p105_p7, %s823_s14, %s107_s21  }
   0xd   : > { %p162_p10 = pnand %p646_p6, %p161_p9 }
   0xe   : > { %p190_p11 = scmp.lt.s32.totalorder (!%p162_p10), %s827_s15, 1  ;;  %s186_s30 = sand.u32 (!%p162_p10), 1, %s819_s13  }
   0xf   : > { %165 = sbr.rel (%p162_p10) target bundleno = 231 (0xe7), region = 32  ;;  %s647_s4 = sshll.u32 (!%p162_p10), %s186_s30, 8 }
  0x10   : > { %s696_s6 = sshll.u32 (!%p162_p10), %s827_s15, 8  ;;  %s546_s11 = scalar_lea.sflag (!%p162_p10), [#allocation3], %s186_s30 }
  0x11   : > { %s559_s9 = scalar_lea.hbm (!%p162_p10), %s1103_s3, %s696_s6 }
  0x12   : > { %s562_s10 = sshll.u32 (!%p162_p10), %s559_s9, 4  ;;  %s563_s10 = int_to_ptr.hbm [resolvable:$true] %s562_s10 }
  0x13   : > { %s771_s18 = sshra.s32 (!%p162_p10), %s563_s10, 4  ;;  %s772_s18 = int_to_ptr.hbm [resolvable:$true] %s771_s18 }
  0x14   : > { %v837_v0 = vmov 0   ;;  %s191_s26 = scalar_select %p190_p11, %s827_s15, 1  ;;  %v208_v1 = vld [vmem:[%s1102_s2] sm:$0xff]  ;;  %v209_v6 = vld [vmem:[%s1102_s2 + $0x8] sm:$0xff]  ;;  %vm264_vm0 = vcmask 1043456   ;;  %vm251_vm1 = vcmask 31744  }
  0x15   : > { %755 = vset.pattern.permute.xlu0 %v837_v0  ;;  %756 = vset.pattern.permute.xlu1 %v837_v0  ;;  %v200_v7 = vld [vmem:[%s1101_s1] sm:$0xff]  ;;  %v210_v16 = vld [vmem:[%s1102_s2 + $0x10] sm:$0xff]  ;;  %v201_v17 = vld [vmem:[%s1101_s1 + $0x8] sm:$0xff]  ;;  %s773_s19 = scalar_lea.hbm %s772_s18, 256  ;;  %p778_p1 = scmp.lt.s32.totalorder %s772_s18, %s1103_s3 }
  0x16   : > { %214 = vperm.xlu0 %755, %v208_v1   ;;  %s695_s29 = sshll.u32 %s191_s26, 5  ;;  %224 = vperm.xlu1 %756, %v210_v16   ;;  %v211_v18 = vld [vmem:[%s1102_s2 + $0x18] sm:$0xff]  ;;  %v202_v19 = vld [vmem:[%s1101_s1 + $0x10] sm:$0xff]  ;;  %p774_p12 = scmp.ne.s32.totalorder %s772_s18, %s773_s19 }
  0x17   : > { %s197_s5 = scalar_lea.vmem %s1100_s0, %s695_s29  ;;  %v203_v20 = vld [vmem:[%s1101_s1 + $0x18] sm:$0xff]  ;;  %s777_s26 = scalar_lea.hbm %s1103_s3, 512 }
  0x18   : > { %v204_v2 = vld [vmem:[%s197_s5] sm:$0xff]  ;;  %v205_v3 = vld [vmem:[%s197_s5 + $0x8] sm:$0xff]  ;;  %v207_v4 = vld [vmem:[%s197_s5 + $0x18] sm:$0xff]  ;;  %p775_p13 = pnand %p774_p12, %p900_p4  ;;  %p779_p2 = scmp.lt.s32.totalorder %s777_s26, %s773_s19 }
  0x19   : > { %236 = vst [vmem:[#allocation1] ss:$2 sm:$0xff] %v204_v2  ;;  %v206_v5 = vld [vmem:[%s197_s5 + $0x10] sm:$0xff]  ;;  %s991_s5 = scalar_lea.vmem [#allocation2], %s647_s4 }
  0x1a   : > { %238 = vst [vmem:[#allocation1 + $0x10] ss:$2 sm:$0xff] %v205_v3  ;;  %s560_s15 = sshll.u32 %s991_s5, 4  ;;  %p776_p0 = pneg %p775_p13  ;;  %s561_s15 = int_to_ptr.vmem [resolvable:$true] %s560_s15 }
  0x1b   : > { %242 = vst [vmem:[#allocation1 + $0x30] ss:$2 sm:$0xff] %v207_v4  ;;  %p780_p3 = por %p779_p2, %p778_p1 }
  0x1c   : > { %240 = vst [vmem:[#allocation1 + $0x20] ss:$2 sm:$0xff] %v206_v5 }
  0x1d   : > { %p781_p5 = pnand %p780_p3, %p776_p0 }
  0x1e   : > { %219 = vperm.xlu0 %755, %v209_v6   ;;  %229 = vperm.xlu1 %756, %v211_v18  }
  0x20   : > { %v243_v8 = vld.sshfl [vmem:[#allocation1] sm:$0xff pattern:$0x75316420]  ;;  %v244_v9 = vld.sshfl [vmem:[#allocation1 + $0x8] sm:$0xff pattern:$0x75316420] }
  0x21   : > { %650 = vmatpush.msk.msra.mxu0 %vm264_vm0, %v243_v8  ;;  %655 = vmatpush.msk.msra.mxu1 %vm264_vm0, %v244_v9  ;;  %v245_v10 = vld.sshfl [vmem:[#allocation1 + $0x10] sm:$0xff pattern:$0x75316420]  ;;  %v246_v11 = vld.sshfl [vmem:[#allocation1 + $0x18] sm:$0xff pattern:$0x75316420] }
  0x22   : > { %660 = vmatpush.msk.msra.mxu2 %vm264_vm0, %v245_v10  ;;  %665 = vmatpush.msk.msra.mxu3 %vm264_vm0, %v246_v11  ;;  %v249_v12 = vld.sshfl [vmem:[#allocation1 + $0x30] sm:$0xff pattern:$0x75316420]  ;;  %v250_v13 = vld.sshfl [vmem:[#allocation1 + $0x38] sm:$0xff pattern:$0x75316420] }
  0x23   : > { %651 = vmatmul.msk.f32.vlgmr.msra.gmra.mxu0 %vm251_vm1, %v200_v7  ;;  %656 = vmatmul.msk.f32.vlgmr.msra.gmra.mxu1 %vm251_vm1, %v200_v7  ;;  %v247_v14 = vld.sshfl [vmem:[#allocation1 + $0x20] sm:$0xff pattern:$0x75316420]  ;;  %v248_v15 = vld.sshfl [vmem:[#allocation1 + $0x28] sm:$0xff pattern:$0x75316420] }
  0x24   : > { %661 = vmatmul.msk.f32.vlgmr.msra.gmra.mxu2 %vm251_vm1, %v200_v7  ;;  %666 = vmatmul.msk.f32.vlgmr.msra.gmra.mxu3 %vm251_vm1, %v200_v7 }
  0x25   : > { %680 = vmatpush.msk.msrb.mxu2 %vm264_vm0, %v249_v12  ;;  %685 = vmatpush.msk.msrb.mxu3 %vm264_vm0, %v250_v13 }
  0x26   : > { %670 = vmatpush.msk.msrb.mxu0 %vm264_vm0, %v247_v14  ;;  %675 = vmatpush.msk.msrb.mxu1 %vm264_vm0, %v248_v15 }
  0x2b   : > { %652 = vmatmul.msk.f32.gmra.mxu0 %vm251_vm1, %v201_v17  ;;  %657 = vmatmul.msk.f32.gmra.mxu1 %vm251_vm1, %v201_v17 }
  0x2c   : > { %662 = vmatmul.msk.f32.gmra.mxu2 %vm251_vm1, %v201_v17  ;;  %667 = vmatmul.msk.f32.gmra.mxu3 %vm251_vm1, %v201_v17 }
  0x33   : > { %653 = vmatmul.msk.f32.gmra.mxu0 %vm251_vm1, %v202_v19  ;;  %658 = vmatmul.msk.f32.gmra.mxu1 %vm251_vm1, %v202_v19 }
  0x34   : > { %663 = vmatmul.msk.f32.gmra.mxu2 %vm251_vm1, %v202_v19  ;;  %668 = vmatmul.msk.f32.gmra.mxu3 %vm251_vm1, %v202_v19 }
  0x3b   : > { %654 = vmatmul.msk.f32.gmra.mxu0 %vm251_vm1, %v203_v20  ;;  %659 = vmatmul.msk.f32.gmra.mxu1 %vm251_vm1, %v203_v20 }
  0x3c   : > { %664 = vmatmul.msk.f32.gmra.mxu2 %vm251_vm1, %v203_v20  ;;  %669 = vmatmul.msk.f32.gmra.mxu3 %vm251_vm1, %v203_v20 }
  0x43   : > { %671 = vmatmul.msk.f32.vlgmr.msrb.gmra.mxu0 %vm251_vm1, %v200_v7  ;;  %676 = vmatmul.msk.f32.vlgmr.msrb.gmra.mxu1 %vm251_vm1, %v200_v7 }
  0x44   : > { %681 = vmatmul.msk.f32.vlgmr.msrb.gmra.mxu2 %vm251_vm1, %v200_v7  ;;  %686 = vmatmul.msk.f32.vlgmr.msrb.gmra.mxu3 %vm251_vm1, %v200_v7 }
  0x4b   : > { %672 = vmatmul.msk.f32.gmra.mxu0 %vm251_vm1, %v201_v17  ;;  %677 = vmatmul.msk.f32.gmra.mxu1 %vm251_vm1, %v201_v17 }
  0x4c   : > { %682 = vmatmul.msk.f32.gmra.mxu2 %vm251_vm1, %v201_v17  ;;  %687 = vmatmul.msk.f32.gmra.mxu3 %vm251_vm1, %v201_v17 }
  0x53   : > { %673 = vmatmul.msk.f32.gmra.mxu0 %vm251_vm1, %v202_v19  ;;  %678 = vmatmul.msk.f32.gmra.mxu1 %vm251_vm1, %v202_v19 }
  0x54   : > { %683 = vmatmul.msk.f32.gmra.mxu2 %vm251_vm1, %v202_v19  ;;  %688 = vmatmul.msk.f32.gmra.mxu3 %vm251_vm1, %v202_v19 }
  0x5b   : > { %674 = vmatmul.msk.f32.gmra.mxu0 %vm251_vm1, %v203_v20  ;;  %679 = vmatmul.msk.f32.gmra.mxu1 %vm251_vm1, %v203_v20 }
  0x5c   : > { %684 = vmatmul.msk.f32.gmra.mxu2 %vm251_vm1, %v203_v20  ;;  %689 = vmatmul.msk.f32.gmra.mxu3 %vm251_vm1, %v203_v20 }
  0x88   : > { %v985_v21 = vpop.permute.xlu0 %214  ;;  %v1004_v35 = vpop.permute.xlu1 %224 }
  0x90   : > { %v995_v26 = vpop.permute.xlu0 %219  ;;  %v1015_v44 = vpop.permute.xlu1 %229 }
  0xa0   : > { %v298_v22 = vpop.f32.mrf.mxu0  ;;  %v327_v23 = vpop.f32.mrf.mxu1 }
  0xa1   : > { %v299_v24 = vadd.f32 %v298_v22, %v985_v21  ;;  %v328_v25 = vadd.f32 %v327_v23, %v985_v21 }
  0xa3   : > { %513 = vst [vmem:[%s991_s5] sm:$0xff] %v299_v24 }
  0xa4   : > { %514 = vst [vmem:[%s991_s5 + $0x8] sm:$0xff] %v328_v25 }
  0xa7   : > { %v356_v27 = vpop.f32.mrf.mxu2  ;;  %v385_v28 = vpop.f32.mrf.mxu3 }
  0xa8   : > { %v357_v29 = vadd.f32 %v356_v27, %v985_v21  ;;  %v386_v30 = vadd.f32 %v385_v28, %v985_v21  ;;  %v301_v31 = vpop.f32.mrf.mxu0  ;;  %v330_v32 = vpop.f32.mrf.mxu1 }
  0xa9   : > { %v302_v33 = vadd.f32 %v301_v31, %v995_v26  ;;  %v331_v34 = vadd.f32 %v330_v32, %v995_v26 }
  0xaa   : > { %515 = vst [vmem:[%s991_s5 + $0x10] sm:$0xff] %v357_v29 }
  0xab   : > { %516 = vst [vmem:[%s991_s5 + $0x18] sm:$0xff] %v386_v30 }
  0xac   : > { %521 = vst [vmem:[%s991_s5 + $0x40] sm:$0xff] %v302_v33 }
  0xad   : > { %522 = vst [vmem:[%s991_s5 + $0x48] sm:$0xff] %v331_v34 }
  0xaf   : > { %v359_v36 = vpop.f32.mrf.mxu2  ;;  %v388_v37 = vpop.f32.mrf.mxu3 }
  0xb0   : > { %v360_v38 = vadd.f32 %v359_v36, %v995_v26  ;;  %v389_v39 = vadd.f32 %v388_v37, %v995_v26  ;;  %v304_v40 = vpop.f32.mrf.mxu0  ;;  %v333_v41 = vpop.f32.mrf.mxu1 }
  0xb1   : > { %v305_v42 = vadd.f32 %v304_v40, %v1004_v35  ;;  %v334_v43 = vadd.f32 %v333_v41, %v1004_v35 }
  0xb2   : > { %523 = vst [vmem:[%s991_s5 + $0x50] sm:$0xff] %v360_v38 }
  0xb3   : > { %524 = vst [vmem:[%s991_s5 + $0x58] sm:$0xff] %v389_v39 }
  0xb4   : > { %529 = vst [vmem:[%s991_s5 + $0x80] sm:$0xff] %v305_v42 }
  0xb5   : > { %530 = vst [vmem:[%s991_s5 + $0x88] sm:$0xff] %v334_v43 }
  0xb7   : > { %v362_v45 = vpop.f32.mrf.mxu2  ;;  %v391_v46 = vpop.f32.mrf.mxu3 }
  0xb8   : > { %v363_v47 = vadd.f32 %v362_v45, %v1004_v35  ;;  %v392_v48 = vadd.f32 %v391_v46, %v1004_v35  ;;  %v307_v49 = vpop.f32.mrf.mxu0  ;;  %v336_v50 = vpop.f32.mrf.mxu1 }
  0xb9   : > { %v308_v51 = vadd.f32 %v307_v49, %v1015_v44  ;;  %v337_v52 = vadd.f32 %v336_v50, %v1015_v44 }
  0xba   : > { %531 = vst [vmem:[%s991_s5 + $0x90] sm:$0xff] %v363_v47 }
  0xbb   : > { %532 = vst [vmem:[%s991_s5 + $0x98] sm:$0xff] %v392_v48 }
  0xbc   : > { %537 = vst [vmem:[%s991_s5 + $0xc0] sm:$0xff] %v308_v51 }
  0xbd   : > { %538 = vst [vmem:[%s991_s5 + $0xc8] sm:$0xff] %v337_v52 }
  0xbf   : > { %v365_v53 = vpop.f32.mrf.mxu2  ;;  %v394_v54 = vpop.f32.mrf.mxu3 }
  0xc0   : > { %v366_v55 = vadd.f32 %v365_v53, %v1015_v44  ;;  %v395_v56 = vadd.f32 %v394_v54, %v1015_v44  ;;  %v414_v57 = vpop.f32.mrf.mxu0  ;;  %v443_v58 = vpop.f32.mrf.mxu1 }
  0xc1   : > { %v415_v59 = vadd.f32 %v414_v57, %v985_v21  ;;  %v444_v60 = vadd.f32 %v443_v58, %v985_v21 }
  0xc2   : > { %539 = vst [vmem:[%s991_s5 + $0xd0] sm:$0xff] %v366_v55 }
  0xc3   : > { %540 = vst [vmem:[%s991_s5 + $0xd8] sm:$0xff] %v395_v56 }
  0xc4   : > { %517 = vst [vmem:[%s991_s5 + $0x20] sm:$0xff] %v415_v59 }
  0xc5   : > { %518 = vst [vmem:[%s991_s5 + $0x28] sm:$0xff] %v444_v60 }
  0xc7   : > { %v472_v61 = vpop.f32.mrf.mxu2  ;;  %v501_v62 = vpop.f32.mrf.mxu3 }
  0xc8   : > { %v473_v63 = vadd.f32 %v472_v61, %v985_v21  ;;  %v502_v0 = vadd.f32 %v501_v62, %v985_v21  ;;  %v417_v1 = vpop.f32.mrf.mxu0  ;;  %v446_v2 = vpop.f32.mrf.mxu1 }
  0xc9   : > { %v418_v3 = vadd.f32 %v417_v1, %v995_v26  ;;  %v447_v4 = vadd.f32 %v446_v2, %v995_v26 }
  0xca   : > { %519 = vst [vmem:[%s991_s5 + $0x30] sm:$0xff] %v473_v63 }
  0xcb   : > { %520 = vst [vmem:[%s991_s5 + $0x38] sm:$0xff] %v502_v0 }
  0xcc   : > { %525 = vst [vmem:[%s991_s5 + $0x60] sm:$0xff] %v418_v3 }
  0xcd   : > { %526 = vst [vmem:[%s991_s5 + $0x68] sm:$0xff] %v447_v4 }
  0xcf   : > { %v475_v5 = vpop.f32.mrf.mxu2  ;;  %v504_v6 = vpop.f32.mrf.mxu3 }
  0xd0   : > { %v476_v7 = vadd.f32 %v475_v5, %v995_v26  ;;  %v505_v8 = vadd.f32 %v504_v6, %v995_v26  ;;  %v420_v9 = vpop.f32.mrf.mxu0  ;;  %v449_v10 = vpop.f32.mrf.mxu1 }
  0xd1   : > { %v421_v11 = vadd.f32 %v420_v9, %v1004_v35  ;;  %v450_v12 = vadd.f32 %v449_v10, %v1004_v35 }
  0xd2   : > { %527 = vst [vmem:[%s991_s5 + $0x70] sm:$0xff] %v476_v7 }
  0xd3   : > { %528 = vst [vmem:[%s991_s5 + $0x78] sm:$0xff] %v505_v8 }
  0xd4   : > { %533 = vst [vmem:[%s991_s5 + $0xa0] sm:$0xff] %v421_v11 }
  0xd5   : > { %534 = vst [vmem:[%s991_s5 + $0xa8] sm:$0xff] %v450_v12 }
  0xd7   : > { %v478_v13 = vpop.f32.mrf.mxu2  ;;  %v507_v14 = vpop.f32.mrf.mxu3 }
  0xd8   : > { %v479_v15 = vadd.f32 %v478_v13, %v1004_v35  ;;  %v508_v16 = vadd.f32 %v507_v14, %v1004_v35  ;;  %v423_v17 = vpop.f32.mrf.mxu0  ;;  %v452_v18 = vpop.f32.mrf.mxu1 }
  0xd9   : > { %v424_v19 = vadd.f32 %v423_v17, %v1015_v44  ;;  %v453_v20 = vadd.f32 %v452_v18, %v1015_v44 }
  0xda   : > { %535 = vst [vmem:[%s991_s5 + $0xb0] sm:$0xff] %v479_v15 }
  0xdb   : > { %536 = vst [vmem:[%s991_s5 + $0xb8] sm:$0xff] %v508_v16 }
  0xdc   : > { %541 = vst [vmem:[%s991_s5 + $0xe0] sm:$0xff] %v424_v19 }
  0xdd   : > { %542 = vst [vmem:[%s991_s5 + $0xe8] sm:$0xff] %v453_v20 }
  0xdf   : > { %v481_v21 = vpop.f32.mrf.mxu2  ;;  %v510_v22 = vpop.f32.mrf.mxu3 }
  0xe0   : > { %v482_v23 = vadd.f32 %v481_v21, %v1015_v44  ;;  %v511_v24 = vadd.f32 %v510_v22, %v1015_v44 }
  0xe2   : > { %543 = vst [vmem:[%s991_s5 + $0xf0] sm:$0xff] %v482_v23 }
  0xe3   : > { %544 = vst [vmem:[%s991_s5 + $0xf8] sm:$0xff] %v511_v24 }
  0xe4   : > { %784 = shalt.err (!%p781_p5)
}
  0xe5   : > { %s838_s29 = smov 1024   ;;  %s839_s30 = smov 64  }
  0xe6   : > { %697 = dma.vmem_to_hbm [thread:$0]  (%p900_p4), %s561_s15, 4096, %s563_s10, %s546_s11, %s838_s29, %s838_s29, %s839_s30  }
  0xe7 PF: > { %p703_p6 = scmp.ge.s32.totalorder %s835_s17, 2  ;;  %s577_s4 = sand.u32 1, %s815_s12  }
  0xe8   : > { %s578_s5 = scalar_lea.sflag [#allocation3], %s577_s4 }
  0xe9   : > { %p700_p7 = pnand %p703_p6, %p907_p8 }
  0xeb   : > { %p701_p9 = pneg %p700_p7 }
  0xed   : > { %810 = dma.done.wait (%p701_p9), %s578_s5, 4096  }
  0xee   : > { %812 = vsyncadd (%p701_p9), %s578_s5, 4294963200  ;;  %s16_s17 = sadd.s32 1, %s835_s17   ;;  %s1106_s12 = smov %s819_s13 }
  0xef   : > { %p13_p10 = scmp.ge.s32.totalorder %s16_s17, 4   ;;  %s1107_s13 = smov %s823_s14 }
  0xf0   : > { %s1108_s14 = smov %s913_s25  ;;  %s1109_s15 = smov %s831_s16 }
  0xf1   : > { %s1110_s16 = smov %s1112_s20  ;;  %15 = sbr.rel (!%p13_p10) target bundleno = 4 (0x4), region = 70 }
  0xf6   :  { %584 = vsyncpa [#allocation3], 1 }
  0xf7   :  { %586 = vsyncpa [#allocation3 + $0x1], 1 }

</bundles_post_ra>
